<compile_context>
chip_gen: v7x
topology: tpu7x:2x2x1
jax: 0.10.0
libtpu: 0.0.40
codegen_flags: <defaults>
</compile_context>

<pallas_src>
import jax
import jax.numpy as jnp
from jax.experimental import pallas as pl
from jax.experimental.pallas import tpu as pltpu


def _make_cnn_kernel(tb, l_out):
    def cnn_kernel(x_ref, w_ref, b_ref, o_ref):
        # x_ref: (tb*l_out, k*C_in)  im2col windows (built lane-dense in the wrapper)
        # w_ref: (k*C_in, C_out)     packed conv weight (all k taps fused)
        # b_ref: (1, C_out)          bias row
        # o_ref: (tb, C_out)         pooled output tile
        conv = jnp.dot(x_ref[...], w_ref[...], preferred_element_type=jnp.float32)
        conv = conv.reshape(tb, l_out, conv.shape[-1])        # (tb, L_out, C_out)
        # Global max over time == MaxPool1d(L_out); bias fused after the max.
        out = jnp.max(conv, axis=1) + b_ref[...]              # (tb, C_out)
        o_ref[...] = out.astype(o_ref.dtype)

    return cnn_kernel


def _default_batch_tile(batch):
    """Pick the batch tile: 1 grid step on single-TC chips, 2 balanced steps otherwise."""
    try:
        kind = jax.devices()[0].device_kind.lower()
    except Exception:  # pragma: no cover - defensive
        kind = ""
    single_tc = ("v5 lite" in kind) or ("v5e" in kind) or ("v6" in kind)
    n_steps = 1 if (single_tc or batch < 16) else 2
    tb = -(-batch // n_steps)          # ceil
    return ((tb + 7) // 8) * 8         # multiple of 8 -> block rows multiple of 8


def cnn_forward(x, conv_w, conv_b, *, compute_dtype=jnp.bfloat16, tb=None):
    """x: (B, C_in, L_in); conv_w: (C_out, C_in, k) (PyTorch Conv1d layout); conv_b: (C_out,)."""
    B, C_in, L_in = x.shape
    C_out, C_in_w, k = conv_w.shape
    assert C_in_w == C_in
    L_out = L_in - k + 1
    assert L_out >= 1

    # ---- Batch-tile sizing --------------------------------------------------
    if tb is None:
        tb = _default_batch_tile(B)
    else:
        tb = max(8, ((tb + 7) // 8) * 8)
    n_steps = -(-B // tb)
    b_pad = n_steps * tb

    # ---- Parameter packing (one-time, tiny) ----------------------------------
    # Row index of the fused weight = j*C_in + c  (j = tap index, c = input channel).
    w_mat = jnp.transpose(conv_w, (2, 1, 0)).reshape(k * C_in, C_out).astype(compute_dtype)
    b_row = conv_b.reshape(1, C_out).astype(jnp.float32)

    # ---- im2col in the wrapper (layout plumbing -> XLA, not the kernel) ------
    xt = jnp.transpose(x, (0, 2, 1))                                       # (B, L_in, C_in)
    xw = jnp.concatenate([xt[:, j:j + L_out, :] for j in range(k)], axis=2)  # (B, L_out, k*C_in)
    if b_pad != B:
        xw = jnp.pad(xw, ((0, b_pad - B), (0, 0), (0, 0)))
    xw = xw.reshape(b_pad * L_out, k * C_in).astype(compute_dtype)         # lane-dense rows

    rows = tb * L_out
    kernel = _make_cnn_kernel(tb, L_out)

    cost = pl.CostEstimate(
        flops=2 * b_pad * L_out * (k * C_in) * C_out,
        transcendentals=0,
        bytes_accessed=(xw.size * xw.dtype.itemsize
                        + w_mat.size * w_mat.dtype.itemsize
                        + b_row.size * 4
                        + b_pad * C_out * 4),
    )

    out = pl.pallas_call(
        kernel,
        out_shape=jax.ShapeDtypeStruct((b_pad, C_out), jnp.float32),
        grid=(n_steps,),
        in_specs=[
            pl.BlockSpec((rows, k * C_in), lambda i: (i, 0)),   # im2col batch tile
            pl.BlockSpec((k * C_in, C_out), lambda i: (0, 0)),  # fused weight (grid-invariant)
            pl.BlockSpec((1, C_out), lambda i: (0, 0)),         # bias row (grid-invariant)
        ],
        out_specs=pl.BlockSpec((tb, C_out), lambda i: (i, 0)),
        compiler_params=pltpu.CompilerParams(
            dimension_semantics=("parallel",),
        ),
        cost_estimate=cost,
    )(xw, w_mat, b_row)

    out = out[:B] if b_pad != B else out
    return out.astype(x.dtype)


def cnn_reference(x, conv_w, conv_b):
    B, C_in, L_in = x.shape
    C_out, _, k = conv_w.shape
    L_out = L_in - k + 1
    conv = jnp.zeros((B, C_out, L_out), jnp.float32) + conv_b[None, :, None]
    for j in range(k):
        conv = conv + jnp.einsum('oc,bct->bot', conv_w[:, :, j], x[:, :, j:j + L_out])
    # MaxPool1d(L_out, stride=3) over length L_out has exactly one window -> global max.
    return jnp.max(conv, axis=2).astype(x.dtype)


if __name__ == "__main__":
    batch_size = 16
    word_embed_size = 64       # C_in  (module default 300, kept small here)
    window_embed_size = 128    # C_out / number of filters (module default)
    k = 2                      # conv kernel size (module default)
    seq_len = 9                # L_in -> L_out = 8

    key = jax.random.PRNGKey(0)
    kx, kw, kb = jax.random.split(key, 3)

    bound = 1.0 / (word_embed_size * k) ** 0.5   # PyTorch Conv1d default init bound
    x = jax.random.normal(kx, (batch_size, word_embed_size, seq_len), dtype=jnp.float32)
    conv_w = jax.random.uniform(kw, (window_embed_size, word_embed_size, k),
                                minval=-bound, maxval=bound, dtype=jnp.float32)
    conv_b = jax.random.uniform(kb, (window_embed_size,),
                                minval=-bound, maxval=bound, dtype=jnp.float32)

    ref = cnn_reference(x, conv_w, conv_b)

    # f32 MXU path: tight-tolerance correctness check.
    out_f32 = jax.block_until_ready(cnn_forward(x, conv_w, conv_b, compute_dtype=jnp.float32))
    assert out_f32.shape == (batch_size, window_embed_size)
    assert jnp.allclose(out_f32, ref, atol=1e-4, rtol=1e-4), "f32 mismatch vs reference"

    # bf16 MXU path (default: native MXU rate on v6e/v7x, f32 accumulation).
    out_bf16 = jax.block_until_ready(cnn_forward(x, conv_w, conv_b))
    assert out_bf16.shape == (batch_size, window_embed_size)
    assert jnp.allclose(out_bf16, ref, atol=5e-2, rtol=5e-2), "bf16 mismatch vs reference"

    print("KERNEL_OK")
</pallas_src>

<mosaic_0001>
module attributes {stable_mosaic.version = 11 : i64} {
  func.func @cnn_kernel(%arg0: i32, %arg1: memref<64x128xf32, #tpu.memory_space<vmem>>, %arg2: memref<128x128xf32, #tpu.memory_space<vmem>>, %arg3: memref<1x128xf32, #tpu.memory_space<vmem>>, %arg4: memref<8x128xf32, #tpu.memory_space<vmem>>) attributes {dimension_semantics = [#tpu.dimension_semantics<parallel>], iteration_bounds = array<i64: 2>, scalar_prefetch = 0 : i64, scratch_operands = 0 : i64, tpu.core_type = #tpu.core_type<tc>, window_params = [{transform_indices = @transform_0, window_bounds = array<i64: 64, 128>}, {pipeline_mode = #tpu.pipeline_mode<synchronous>, transform_indices = @transform_1, window_bounds = array<i64: 128, 128>}, {pipeline_mode = #tpu.pipeline_mode<synchronous>, transform_indices = @transform_2, window_bounds = array<i64: 1, 128>}, {transform_indices = @transform_3, window_bounds = array<i64: 8, 128>}]} {
    %c0 = arith.constant 0 : index
    %c0_0 = arith.constant 0 : index
    %0 = vector.load %arg1[%c0, %c0_0] : memref<64x128xf32, #tpu.memory_space<vmem>>, vector<64x128xf32>
    %c0_1 = arith.constant 0 : index
    %c0_2 = arith.constant 0 : index
    %1 = vector.load %arg2[%c0_1, %c0_2] : memref<128x128xf32, #tpu.memory_space<vmem>>, vector<128x128xf32>
    %cst = arith.constant dense<0.000000e+00> : vector<64x128xf32>
    %2 = tpu.matmul %0, %1, %cst {dimension_numbers = #tpu.dot_dimension_numbers<[1], [0], [0], [1], [0, 0, 1, 1], [], []>} : vector<64x128xf32>, vector<128x128xf32>, vector<64x128xf32> -> vector<64x128xf32>
    %3 = vector.shape_cast %2 : vector<64x128xf32> to vector<8x8x128xf32>
    %cst_3 = arith.constant dense<0xFF800000> : vector<8x128xf32>
    %4 = vector.multi_reduction <maximumf>, %3, %cst_3 [1] : vector<8x8x128xf32> to vector<8x128xf32>
    %c0_4 = arith.constant 0 : index
    %c0_5 = arith.constant 0 : index
    %5 = vector.load %arg3[%c0_4, %c0_5] : memref<1x128xf32, #tpu.memory_space<vmem>>, vector<1x128xf32>
    %6 = vector.broadcast %5 : vector<1x128xf32> to vector<8x128xf32>
    %7 = arith.addf %4, %6 : vector<8x128xf32>
    %c0_6 = arith.constant 0 : index
    %c0_7 = arith.constant 0 : index
    %8 = vector.load %arg4[%c0_6, %c0_7] : memref<8x128xf32, #tpu.memory_space<vmem>>, vector<8x128xf32>
    tpu.vector_store %arg4[%c0_6, %c0_7], %7 {strides = array<i32>} : memref<8x128xf32, #tpu.memory_space<vmem>>, vector<8x128xf32>,
    return
  }
  func.func @transform_0(%arg0: i32) -> (i32, i32) {
    %c0_i32 = arith.constant 0 : i32
    %c0_i32_0 = arith.constant 0 : i32
    return %arg0, %c0_i32 : i32, i32
  }
  func.func @transform_1(%arg0: i32) -> (i32, i32) {
    %c0_i32 = arith.constant 0 : i32
    %c0_i32_0 = arith.constant 0 : i32
    %c0_i32_1 = arith.constant 0 : i32
    return %c0_i32, %c0_i32_0 : i32, i32
  }
  func.func @transform_2(%arg0: i32) -> (i32, i32) {
    %c0_i32 = arith.constant 0 : i32
    %c0_i32_0 = arith.constant 0 : i32
    %c0_i32_1 = arith.constant 0 : i32
    return %c0_i32, %c0_i32_0 : i32, i32
  }
  func.func @transform_3(%arg0: i32) -> (i32, i32) {
    %c0_i32 = arith.constant 0 : i32
    %c0_i32_0 = arith.constant 0 : i32
    return %arg0, %c0_i32 : i32, i32
  }
}

</mosaic_0001>

<bundles_post_ra>
// kernel: tpu_custom_call.1
= control target key start
LH: loop header
LB: loop body
LE: loop exit
PB: predicated region body
PF: predicated region fallthrough
CT: control target
= control target key end

     0   :  { %8 = vsyncpa [#allocation3], 0  ;;  %s1088_s0 = inlined_call_operand.hbm [shape: f32[128,128], index: 0, kind: input, shape index: {}]   ;;  %s1089_s1 = inlined_call_operand.hbm [shape: f32[128,128], index: 1, kind: input, shape index: {}]   ;;  %s1090_s2 = inlined_call_operand.vmem [shape: f32[1,128], index: 2, kind: input, shape index: {}]   ;;  %s1091_s3 = inlined_call_operand.hbm [shape: f32[16,128], index: 3, kind: output, shape index: {}]  }
   0x1   :  { %10 = vsyncpa [#allocation3 + $0x1], 0 }
   0x2   :  { %11 = vsyncpa [#allocation6], 0 }
   0x3   :  { %12 = vsyncpa [#allocation4], 0 }
   0x4   :  { %14 = vsyncpa [#allocation4 + $0x1], 0  ;;  %s869_s12 = smov 0   ;;  %s871_s13 = smov 0  }
   0x5   :  { %s873_s14 = smov 0   ;;  %s875_s15 = smov 0  }
   0x6 LB: > { %s890_s16 = sadd.s32 4294967295, %s842_s15   ;;  %s522_s17 = sadd.s32 4294967294, %s842_s15   ;;  %s842_s15 = sphi %s875_s15, %s1111_s15   ;;  %s838_s14 = sphi %s873_s14, %s1110_s14   ;;  %s834_s13 = sphi %s871_s13, %s1109_s13   ;;  %s830_s12 = sphi %s869_s12, %s1108_s12  }
   0x7   : > { %p40_p0 = scmp.ne.s32.totalorder %s834_s13, %s830_s12  ;;  %p1092_p1 = scmp.eq.s32.totalorder %s890_s16, 0 }
   0x8   : > { %p112_p3 = scmp.eq.s32.totalorder %s522_s17, 1  ;;  %p523_p5 = scmp.ge.s32.totalorder %s842_s15, 1 }
   0x9   : > { %p899_p4 = por %p1092_p1, %p40_p0  ;;  %p119_p7 = scmp.lt.s32.totalorder %s842_s15, 3 }
   0xa   : > { %p904_p6 = por %p112_p3, %p40_p0  ;;  %s844_s21 = smov [#allocation5]  }
   0xb   : > { %s1095_s18 = scalar_select %p899_p4, 1, 0 }
   0xc   : > { %s1096_s19 = scalar_select %p904_p6, 1, 0 }
   0xd   : > { %p909_p8 = pnand %p523_p5, %p119_p7  ;;  %s131_s22 = sshll.u32 %s844_s21, 4  ;;  %s913_s22 = int_to_ptr.vmem [resolvable:$true] %s131_s22 }
   0xe   : > { %s925_s24 = sadd.s32 1, %s842_s15   ;;  %s27_s25 = sadd.s32 1, %s838_s14 }
   0xf   : > { %s1097_s20 = scalar_select %p909_p8, 1, 0 }
  0x10   : > { %p663_p9 = pneg %p909_p8  ;;  %s24_s26 = ssub.s32 %s842_s15, %s925_s24 }
  0x11   : > { %s714_s29 = scalar_lea.hbm %s1089_s1, 2048 }
  0x12   : > { %p920_p11 = pnand %p663_p9, %p1092_p1  ;;  %p715_p12 = scmp.ne.s32.totalorder %s1089_s1, %s714_s29 }
  0x13   : > { %p721_p5 = scmp.lt.u32.totalorder %s714_s29, %s1089_s1 }
  0x14   : > { %p716_p13 = pneg %p920_p11 }
  0x16   : > { %p717_p0 = pnand %p716_p13, %p715_p12 }
  0x18   : > { %p718_p3 = pneg %p717_p0 }
  0x1a   : > { %p723_p7 = pnand %p721_p5, %p718_p3 }
  0x1c   : > { %726 = shalt.err (!%p723_p7)
}
  0x1d   : > { %s727_s7 = scalar_lea.vmem %s913_s22, 2048  ;;  %p735_p2 = scmp.lt.s32.totalorder %s913_s22, %s913_s22 }
  0x1e   : > { %p728_p9 = scmp.ne.s32.totalorder %s913_s22, %s727_s7  ;;  %p736_p6 = scmp.lt.s32.totalorder %s727_s7, %s727_s7 }
  0x20   : > { %p730_p10 = pnand %p728_p9, %p716_p13  ;;  %p737_p4 = por %p736_p6, %p735_p2 }
  0x22   : > { %p731_p1 = pneg %p730_p10 }
  0x24   : > { %p738_p8 = pnand %p737_p4, %p731_p1 }
  0x26   : > { %741 = shalt.err (!%p738_p8)
}
  0x27   : > { %s845_s8 = smov 128   ;;  %s846_s9 = smov 8  }
  0x28   : > { %666 = dma.hbm_to_vmem [thread:$0]  (!%p920_p11), %s1089_s1, 2048, %s913_s22, [#allocation6], %s845_s8, %s845_s8, %s846_s9  }
  0x29   : > { %p25_p1 = scmp.eq.s32.totalorder %s24_s26, 0  ;;  %p34_p2 = scmp.ne.s32.totalorder %s838_s14, %s834_s13 }
  0x2a   : > { %p35_p4 = scmp.eq.s32.totalorder %s842_s15, 0  ;;  %p676_p6 = scmp.lt.s32.totalorder %s842_s15, 2 }
  0x2b   : > { %s959_s17 = scalar_select %p25_p1, %s838_s14, %s27_s25  }
  0x2c   : > { %p36_p8 = por %p35_p4, %p34_p2  ;;  %p1099_p10 = scmp.eq.s32.totalorder %s890_s16, 1 }
  0x2d   : > { %s148_s23 = sand.u32 1, %s838_s14   ;;  %s538_s27 = sshll.u32 %s842_s15, 10 }
  0x2e   : > { %p963_p12 = por %p1099_p10, %p34_p2  ;;  %s526_s28 = sshll.u32 %s148_s23, 6 }
  0x2f   : > { %s972_s4 = scalar_lea.hbm %s1088_s0, %s538_s27  ;;  %s152_s22 = scalar_lea.vmem [#allocation2], %s526_s28 }
  0x30   : > { %s159_s25 = sshll.u32 %s152_s22, 4  ;;  %p974_p11 = pnand %p676_p6, %p36_p8  ;;  %s978_s25 = int_to_ptr.vmem [resolvable:$true] %s159_s25 }
  0x31   : > { %s980_s5 = scalar_lea.sflag [#allocation3], %s148_s23  ;;  %s742_s6 = scalar_lea.hbm %s972_s4, 1024 }
  0x32   : > { %p743_p13 = scmp.ne.s32.totalorder %s972_s4, %s742_s6  ;;  %p744_p0 = pneg %p974_p11 }
  0x33   : > { %s747_s11 = scalar_lea.hbm %s1088_s0, 2048  ;;  %p748_p7 = scmp.lt.u32.totalorder %s972_s4, %s1088_s0 }
  0x34   : > { %p745_p3 = pnand %p744_p0, %p743_p13  ;;  %p749_p9 = scmp.lt.u32.totalorder %s747_s11, %s742_s6 }
  0x35   : > { %p751_p2 = scmp.lt.u32.totalorder %s742_s6, %s972_s4 }
  0x36   : > { %p746_p5 = pneg %p745_p3  ;;  %p750_p1 = por %p749_p9, %p748_p7 }
  0x38   : > { %p752_p4 = por %p751_p2, %p750_p1 }
  0x3a   : > { %p753_p6 = pnand %p752_p4, %p746_p5 }
  0x3c   : > { %756 = shalt.err (!%p753_p6)
}
  0x3d   : > { %s757_s23 = scalar_lea.vmem %s978_s25, 1024  ;;  %s847_s29 = smov [#allocation2]  }
  0x3e   : > { %p758_p8 = scmp.ne.s32.totalorder %s978_s25, %s757_s23  ;;  %s762_s30 = sshll.u32 %s847_s29, 4  ;;  %s763_s30 = int_to_ptr.vmem [resolvable:$false] %s762_s30 }
  0x3f   : > { %s764_s22 = scalar_lea.vmem %s763_s30, 2048  ;;  %p765_p3 = scmp.lt.s32.totalorder %s978_s25, %s763_s30 }
  0x40   : > { %p760_p10 = pnand %p758_p8, %p744_p0  ;;  %p766_p7 = scmp.lt.s32.totalorder %s764_s22, %s757_s23 }
  0x42   : > { %p761_p13 = pneg %p760_p10  ;;  %p767_p9 = por %p766_p7, %p765_p3 }
  0x44   : > { %p768_p1 = pnand %p767_p9, %p761_p13 }
  0x46   : > { %771 = shalt.err (!%p768_p1)
}
  0x47   : > { %670 = dma.hbm_to_vmem [thread:$0]  (!%p974_p11), %s972_s4, 1024, %s978_s25, %s980_s5, %s845_s8, %s845_s8, %s846_s9  }
  0x48   : > { %p1102_p0 = scmp.ne.s32.totalorder %s1097_s20, 0 }
  0x49   : > { %s1014_s6 = sand.u32 (!%p1102_p0), 1, %s834_s13   ;;  %p1103_p5 = scmp.ne.s32.totalorder (!%p1102_p0), %s1095_s18, 0 }
  0x4a   : > { %171 = sbr.rel (%p1102_p0) target bundleno = 373 (0x175), region = 32  ;;  %s530_s7 = sshll.u32 (!%p1102_p0), %s1014_s6, 6 }
  0x4b   : > { %s174_s10 = scalar_lea.sflag (!%p1102_p0), [#allocation3], %s1014_s6  ;;  %s1018_s11 = scalar_lea.vmem (!%p1102_p0), [#allocation2], %s530_s7 }
  0x51   : > { %817 = dma.done.wait (%p1103_p5), %s174_s10, 1024  }
  0x52   : > { %819 = vsyncadd (%p1103_p5), %s174_s10, 4294966272  ;;  %p1104_p11 = scmp.eq.s32.totalorder %s890_s16, 0 }
  0x54   : > { %821 = dma.done.wait (%p1104_p11), [#allocation6], 2048   ;;  %p1105_p2 = pmov %p1104_p11 }
  0x55   : > { %v213_v0 = vld [vmem:[#allocation5] sm:$0xff]  ;;  %v214_v1 = vld [vmem:[#allocation5 + $0x8] sm:$0xff]  ;;  %v215_v2 = vld [vmem:[#allocation5 + $0x10] sm:$0xff]  ;;  %vm406_vm0 = vcmask 1041409   ;;  %s532_s8 = sshll.u32 %s1014_s6, 3  ;;  %vm409_vm1 = vcmask 1042434  }
  0x56   : > { %823 = vsyncadd (%p1105_p2), [#allocation6], 4294965248  ;;  %v607_v3 = vpack.c.bf16 %v214_v1, %v213_v0  ;;  %v216_v4 = vld [vmem:[#allocation5 + $0x18] sm:$0xff]  ;;  %v217_v6 = vld [vmem:[#allocation5 + $0x20] sm:$0xff]  ;;  %vm412_vm2 = vcmask 1043459   ;;  %vm415_vm3 = vcmask 1044484  }
  0x57   : > { %v611_v5 = vpack.c.bf16 %v216_v4, %v215_v2  ;;  %v218_v7 = vld [vmem:[#allocation5 + $0x28] sm:$0xff]  ;;  %v205_v9 = vld [vmem:[%s1018_s11] sm:$0xff]  ;;  %v219_v11 = vld [vmem:[#allocation5 + $0x30] sm:$0xff]  ;;  %vm418_vm4 = vcmask 1045509   ;;  %vm421_vm5 = vcmask 1046534   ;;  %s535_s9 = sshll.u32 %s890_s16, 7 }
  0x58   : > { %608 = vmatprep.subr.bf16.mxu0 %v607_v3  ;;  %639 = vmatprep.subr.bf16.mxu1 %v607_v3  ;;  %v615_v8 = vpack.c.bf16 %v218_v7, %v217_v6  ;;  %v209_v10 = vld [vmem:[%s1018_s11 + $0x20] sm:$0xff]  ;;  %v220_v12 = vld [vmem:[#allocation5 + $0x38] sm:$0xff]  ;;  %v222_v15 = vld [vmem:[#allocation5 + $0x48] sm:$0xff]  ;;  %s203_s4 = scalar_lea.vmem [#allocation7], %s532_s8  ;;  %vm424_vm6 = vcmask 1047559   ;;  %s1044_s27 = scalar_lea.hbm %s1091_s3, %s535_s9 }
  0x59   : > { %610 = vmatpush3.bf16.msra.mxu0 %v607_v3  ;;  %647 = vmatpush3.bf16.msra.mxu1 %v607_v3  ;;  %v619_v13 = vpack.c.bf16 %v220_v12, %v219_v11  ;;  %v221_v14 = vld [vmem:[#allocation5 + $0x40] sm:$0xff]  ;;  %v223_v17 = vld [vmem:[#allocation5 + $0x50] sm:$0xff]  ;;  %v224_v18 = vld [vmem:[#allocation5 + $0x58] sm:$0xff]  ;;  %s442_s25 = sshll.u32 %s203_s4, 4  ;;  %s429_s16 = scalar_lea.sflag [#allocation4], %s1014_s6  ;;  %s1046_s25 = int_to_ptr.vmem [resolvable:$true] %s442_s25 }
  0x5a   : > { %612 = vmatprep.subr.bf16.mxu0 %v611_v5  ;;  %640 = vmatprep.subr.bf16.mxu1 %v611_v5  ;;  %v623_v16 = vpack.c.bf16 %v222_v15, %v221_v14  ;;  %v627_v19 = vpack.c.bf16 %v224_v18, %v223_v17  ;;  %v225_v20 = vld [vmem:[#allocation5 + $0x60] sm:$0xff]  ;;  %v226_v21 = vld [vmem:[#allocation5 + $0x68] sm:$0xff]  ;;  %v227_v23 = vld [vmem:[#allocation5 + $0x70] sm:$0xff]  ;;  %s772_s28 = scalar_lea.vmem %s1046_s25, 128  ;;  %s848_s23 = smov [#allocation7]  }
  0x5b   : > { %595 = vmatprep.mubr.f32.mxu0 %v205_v9  ;;  %601 = vmatprep.mubr.f32.mxu1 %v209_v10  ;;  %v631_v22 = vpack.c.bf16 %v226_v21, %v225_v20  ;;  %v228_v24 = vld [vmem:[#allocation5 + $0x78] sm:$0xff]  ;;  %v206_v26 = vld [vmem:[%s1018_s11 + $0x8] sm:$0xff]  ;;  %v207_v28 = vld [vmem:[%s1018_s11 + $0x10] sm:$0xff]  ;;  %p773_p4 = scmp.ne.s32.totalorder %s1046_s25, %s772_s28  ;;  %s776_s29 = sshll.u32 %s848_s23, 4  ;;  %s777_s29 = int_to_ptr.vmem [resolvable:$false] %s776_s29 }
  0x5c   : > { %v635_v25 = vpack.c.bf16 %v228_v24, %v227_v23  ;;  %v210_v27 = vld [vmem:[%s1018_s11 + $0x28] sm:$0xff]  ;;  %v211_v29 = vld [vmem:[%s1018_s11 + $0x30] sm:$0xff]  ;;  %v208_v30 = vld [vmem:[%s1018_s11 + $0x18] sm:$0xff]  ;;  %s778_s30 = scalar_lea.vmem %s777_s29, 256  ;;  %p779_p10 = scmp.lt.s32.totalorder %s1046_s25, %s777_s29 }
  0x5d   : > { %614 = vmatpush3.bf16.msra.mxu0 %v611_v5  ;;  %648 = vmatpush3.bf16.msra.mxu1 %v611_v5  ;;  %v212_v31 = vld [vmem:[%s1018_s11 + $0x38] sm:$0xff]  ;;  %v533_v3 = vld [vmem:[%s1090_s2] ss:$0 sm:$0xff]  ;;  %p774_p6 = pnand %p773_p4, %p963_p12  ;;  %p780_p13 = scmp.lt.s32.totalorder %s778_s30, %s772_s28 }
  0x5e   : > { %616 = vmatprep.subr.bf16.mxu0 %v615_v8  ;;  %641 = vmatprep.subr.bf16.mxu1 %v615_v8 }
  0x5f   : > { %p775_p8 = pneg %p774_p6  ;;  %p781_p3 = por %p780_p13, %p779_p10 }
  0x61   : > { %618 = vmatpush3.bf16.msra.mxu0 %v615_v8  ;;  %649 = vmatpush3.bf16.msra.mxu1 %v615_v8  ;;  %p782_p7 = pnand %p781_p3, %p775_p8 }
  0x62   : > { %620 = vmatprep.subr.bf16.mxu0 %v619_v13  ;;  %642 = vmatprep.subr.bf16.mxu1 %v619_v13 }
  0x65   : > { %622 = vmatpush3.bf16.msra.mxu0 %v619_v13  ;;  %650 = vmatpush3.bf16.msra.mxu1 %v619_v13 }
  0x66   : > { %624 = vmatprep.subr.bf16.mxu0 %v623_v16  ;;  %643 = vmatprep.subr.bf16.mxu1 %v623_v16 }
  0x69   : > { %626 = vmatpush3.bf16.msra.mxu0 %v623_v16  ;;  %651 = vmatpush3.bf16.msra.mxu1 %v623_v16 }
  0x6a   : > { %628 = vmatprep.subr.bf16.mxu0 %v627_v19  ;;  %644 = vmatprep.subr.bf16.mxu1 %v627_v19 }
  0x6d   : > { %630 = vmatpush3.bf16.msra.mxu0 %v627_v19  ;;  %652 = vmatpush3.bf16.msra.mxu1 %v627_v19 }
  0x6e   : > { %632 = vmatprep.subr.bf16.mxu0 %v631_v22  ;;  %645 = vmatprep.subr.bf16.mxu1 %v631_v22 }
  0x71   : > { %634 = vmatpush3.bf16.msra.mxu0 %v631_v22  ;;  %653 = vmatpush3.bf16.msra.mxu1 %v631_v22 }
  0x72   : > { %636 = vmatprep.subr.bf16.mxu0 %v635_v25  ;;  %646 = vmatprep.subr.bf16.mxu1 %v635_v25 }
  0x75   : > { %638 = vmatpush3.bf16.msra.mxu0 %v635_v25  ;;  %654 = vmatpush3.bf16.msra.mxu1 %v635_v25 }
  0x78   : > { %596 = vmatmul.mubr.f32.vlgmr.msra.gmra.mrb[0].mxu0 %v206_v26  ;;  %602 = vmatmul.mubr.f32.vlgmr.msra.gmra.mrb[0].mxu1 %v210_v27 }
  0x79   : > { %598 = vmatprep.mubr.f32.mxu0 %v207_v28  ;;  %604 = vmatprep.mubr.f32.mxu1 %v211_v29 }
  0x7c   : > { %599 = vmatmul.mubr.f32.gmra.mrb[2].mxu0 %v208_v30  ;;  %605 = vmatmul.mubr.f32.gmra.mrb[2].mxu1 %v212_v31 }
 0x14b   : > { %v597_v32 = vpop.f32.mrb[0].mxu0  ;;  %v603_v33 = vpop.f32.mrb[0].mxu1 }
 0x14c   : > { %v340_v34 = vrot.slane %v597_v32, 4  ;;  %v364_v35 = vrot.slane %v603_v33, 4  ;;  %v295_v36 = vpop.f32.mrb[1].mxu0  ;;  %v315_v37 = vpop.f32.mrb[1].mxu1 }
 0x14d   : > { %v334_v38 = vrot.slane %v295_v36, 4  ;;  %v358_v39 = vrot.slane %v315_v37, 4 }
 0x14e   : > { %v341_v40 = vmax.f32 %v597_v32, %v340_v34  ;;  %v365_v41 = vmax.f32 %v603_v33, %v364_v35 }
 0x14f   : > { %v335_v42 = vmax.f32 %v295_v36, %v334_v38  ;;  %v359_v43 = vmax.f32 %v315_v37, %v358_v39  ;;  %v600_v44 = vpop.f32.mrb[2].mxu0  ;;  %v606_v45 = vpop.f32.mrb[2].mxu1 }
 0x150   : > { %v342_v46 = vrot.slane %v341_v40, 2  ;;  %v366_v47 = vrot.slane %v365_v41, 2  ;;  %v352_v48 = vrot.slane %v600_v44, 4  ;;  %v376_v49 = vrot.slane %v606_v45, 4  ;;  %v305_v50 = vpop.f32.mrb[3].mxu0  ;;  %v325_v51 = vpop.f32.mrb[3].mxu1 }
 0x151   : > { %v336_v52 = vrot.slane %v335_v42, 2  ;;  %v360_v53 = vrot.slane %v359_v43, 2  ;;  %v346_v54 = vrot.slane %v305_v50, 4  ;;  %v370_v55 = vrot.slane %v325_v51, 4 }
 0x152   : > { %v343_v56 = vmax.f32 %v341_v40, %v342_v46  ;;  %v367_v57 = vmax.f32 %v365_v41, %v366_v47  ;;  %v353_v58 = vmax.f32 %v600_v44, %v352_v48  ;;  %v377_v59 = vmax.f32 %v606_v45, %v376_v49 }
 0x153   : > { %v337_v60 = vmax.f32 %v335_v42, %v336_v52  ;;  %v361_v61 = vmax.f32 %v359_v43, %v360_v53  ;;  %v347_v62 = vmax.f32 %v305_v50, %v346_v54  ;;  %v371_v63 = vmax.f32 %v325_v51, %v370_v55 }
 0x154   : > { %v344_v0 = vrot.slane %v343_v56, 1  ;;  %v354_v1 = vrot.slane %v353_v58, 2  ;;  %v378_v2 = vrot.slane %v377_v59, 2  ;;  %v368_v9 = vrot.slane %v367_v57, 1 }
 0x155   : > { %v338_v4 = vrot.slane %v337_v60, 1  ;;  %v362_v5 = vrot.slane %v361_v61, 1  ;;  %v348_v6 = vrot.slane %v347_v62, 2  ;;  %v372_v7 = vrot.slane %v371_v63, 2 }
 0x156   : > { %v345_v8 = vmax.f32 %v343_v56, %v344_v0  ;;  %v355_v10 = vmax.f32 %v353_v58, %v354_v1  ;;  %v379_v11 = vmax.f32 %v377_v59, %v378_v2  ;;  %v369_v23 = vmax.f32 %v367_v57, %v368_v9 }
 0x157   : > { %v339_v12 = vmax.f32 %v337_v60, %v338_v4  ;;  %v349_v13 = vmax.f32 %v347_v62, %v348_v6  ;;  %v373_v14 = vmax.f32 %v371_v63, %v372_v7  ;;  %v363_v19 = vmax.f32 %v361_v61, %v362_v5 }
 0x158   : > { %v390_v15 = vadd.f32 %v533_v3, %v345_v8  ;;  %v356_v16 = vrot.slane %v355_v10, 1  ;;  %v380_v17 = vrot.slane %v379_v11, 1  ;;  %v394_v32 = vadd.f32 %v533_v3, %v369_v23 }
 0x159   : > { %v389_v18 = vadd.f32 %v533_v3, %v339_v12  ;;  %v350_v20 = vrot.slane %v349_v13, 1  ;;  %v374_v21 = vrot.slane %v373_v14, 1  ;;  %v393_v30 = vadd.f32 %v533_v3, %v363_v19 }
 0x15a   : > { %v405_v22 = vrot.slane %v390_v15, 7  ;;  %v357_v24 = vmax.f32 %v355_v10, %v356_v16  ;;  %v381_v29 = vmax.f32 %v379_v11, %v380_v17  ;;  %v417_v39 = vrot.slane %v394_v32, 3 }
 0x15b   : > { %v351_v25 = vmax.f32 %v349_v13, %v350_v20  ;;  %v375_v26 = vmax.f32 %v373_v14, %v374_v21  ;;  %v414_v37 = vrot.slane %v393_v30, 4 }
 0x15c   : > { %v407_v27 = vsel %vm406_vm0, %v405_v22, %v389_v18  ;;  %v392_v28 = vadd.f32 %v533_v3, %v357_v24  ;;  %v396_v36 = vadd.f32 %v533_v3, %v381_v29 }
 0x15d   : > { %v391_v31 = vadd.f32 %v533_v3, %v351_v25  ;;  %v395_v34 = vadd.f32 %v533_v3, %v375_v26 }
 0x15e   : > { %v411_v35 = vrot.slane %v392_v28, 5  ;;  %v423_v43 = vrot.slane %v396_v36, 1 }
 0x15f   : > { %v408_v33 = vrot.slane %v391_v31, 6  ;;  %v420_v41 = vrot.slane %v395_v34, 2 }
 0x161   : > { %v410_v38 = vsel %vm409_vm1, %v408_v33, %v407_v27 }
 0x162   : > { %v413_v40 = vsel %vm412_vm2, %v411_v35, %v410_v38 }
 0x163   : > { %v416_v42 = vsel %vm415_vm3, %v414_v37, %v413_v40 }
 0x164   : > { %v419_v44 = vsel %vm418_vm4, %v417_v39, %v416_v42 }
 0x165   : > { %v422_v45 = vsel %vm421_vm5, %v420_v41, %v419_v44 }
 0x166   : > { %v425_v46 = vsel %vm424_vm6, %v423_v43, %v422_v45 }
 0x167   : > { %427 = vst [vmem:[%s203_s4] sm:$0xff] %v425_v46 }
 0x168   : > { %785 = shalt.err (!%p782_p7)
}
 0x169   : > { %s786_s22 = scalar_lea.hbm %s1044_s27, 128  ;;  %s790_s10 = scalar_lea.hbm %s1091_s3, 256 }
 0x16a   : > { %p787_p9 = scmp.ne.s32.totalorder %s1044_s27, %s786_s22  ;;  %p791_p5 = scmp.lt.u32.totalorder %s1044_s27, %s1091_s3 }
 0x16b   : > { %p792_p11 = scmp.lt.u32.totalorder %s790_s10, %s786_s22  ;;  %p794_p4 = scmp.lt.u32.totalorder %s786_s22, %s1044_s27 }
 0x16c   : > { %p788_p1 = pnand %p787_p9, %p963_p12 }
 0x16d   : > { %p793_p2 = por %p792_p11, %p791_p5 }
 0x16e   : > { %p789_p0 = pneg %p788_p1 }
 0x16f   : > { %p795_p6 = por %p794_p4, %p793_p2 }
 0x171   : > { %p796_p8 = pnand %p795_p6, %p789_p0 }
 0x173   : > { %799 = shalt.err (!%p796_p8)
}
 0x174   : > { %661 = dma.vmem_to_hbm [thread:$0]  (%p963_p12), %s1046_s25, 128, %s1044_s27, %s429_s16  }
 0x175 PF: > { %s454_s20 = sand.u32 1, %s830_s12   ;;  %p1106_p10 = scmp.ne.s32.totalorder %s1096_s19, 0 }
 0x176   : > { %p1107_p13 = scmp.ge.s32.totalorder %s842_s15, 2  ;;  %s455_s8 = scalar_lea.sflag [#allocation4], %s454_s20 }
 0x178   : > { %p672_p3 = pnand %p1107_p13, %p1106_p10 }
 0x17a   : > { %825 = dma.done.wait (!%p672_p3), %s455_s8, 128  }
 0x17b   : > { %827 = vsyncadd (!%p672_p3), %s455_s8, 4294967168  ;;  %p17_p7 = scmp.ge.s32.totalorder %s925_s24, 4   ;;  %s1108_s12 = smov %s834_s13 }
 0x17c   : > { %s1109_s13 = smov %s838_s14  ;;  %s1110_s14 = smov %s959_s17 }
 0x17d   : > { %s1111_s15 = smov %s925_s24  ;;  %19 = sbr.rel (!%p17_p7) target bundleno = 6 (0x6), region = 81 }
 0x184   :  { %460 = vsyncpa [#allocation3], 1 }
 0x185   :  { %462 = vsyncpa [#allocation3 + $0x1], 1 }
 0x186   :  { %463 = vsyncpa [#allocation6], 1 }
 0x187   :  { %464 = vsyncpa [#allocation4], 1 }
 0x188   :  { %466 = vsyncpa [#allocation4 + $0x1], 1 }

</bundles_post_ra>
